<compile_context>
chip_gen: v6e
topology: v6e:2x2x1
jax: 0.10.0
libtpu: 0.0.40
codegen_flags: <defaults>
</compile_context>

<pallas_src>
import math

import jax
import jax.numpy as jnp
import numpy as np
from jax import lax
from jax.experimental import pallas as pl
from jax.experimental.pallas import tpu as pltpu

_MASK_NEG = -1e18  # Python float: inlined as a literal, never captured as a traced constant.


def _layer_norm(x, gamma, beta, eps=1e-6):
    mu = jnp.mean(x, axis=-1, keepdims=True)
    var = jnp.mean(jnp.square(x - mu), axis=-1, keepdims=True)
    return (x - mu) * lax.rsqrt(var + eps) * gamma + beta


# ---------------------------------------------------------------------------
# Kernel 1: pre-attention LayerNorm + fused QKV projection (one (D, 3D) MXU pass).
# Writes a single lane-dense (tS, 3D) slab; Q/K/V split is wrapper-side plumbing.
# ---------------------------------------------------------------------------
def ln_qkv_kernel(x_ref, g_ref, b_ref, wqkv_ref, bqkv_ref, qkv_ref):
    x = x_ref[0].astype(jnp.float32)                       # (tS, D)
    xn = _layer_norm(x, g_ref[...], b_ref[...])
    # single wide matmul: bf16 operands, f32 accumulation
    qkv = jnp.dot(xn.astype(jnp.bfloat16), wqkv_ref[...],
                  preferred_element_type=jnp.float32) + bqkv_ref[...]
    qkv_ref[0] = qkv.astype(qkv_ref.dtype)                 # (tS, 3D) bf16, lane-dense store


# ---------------------------------------------------------------------------
# Kernel 2: multi-head scaled-dot-product attention, batched over heads.
# q/k/v arrive head-major (H, tS/S, dh); the 1/sqrt(dh) scale is folded into wq.
# ---------------------------------------------------------------------------
def attn_kernel(q_ref, k_ref, v_ref, m_ref, ctx_ref):
    q = q_ref[0]                                           # (H, tS, dh) bf16
    k = k_ref[0]                                           # (H, S,  dh) bf16
    v = v_ref[0]                                           # (H, S,  dh) bf16
    s = jnp.einsum("hqd,hkd->hqk", q, k, preferred_element_type=jnp.float32)  # (H, tS, S)
    # mask bias computed once (not per head); mask block is (tS, S) or (1, S) key-padding
    bias = jnp.where(m_ref[0].astype(jnp.float32) > 0.5, _MASK_NEG, 0.0)
    s = s + bias[None]
    s = s - jnp.max(s, axis=-1, keepdims=True)
    p = jnp.exp(s)
    # EUP reciprocal instead of a VPU divide over the (H, tS, S) tile
    p = p * pl.reciprocal(jnp.sum(p, axis=-1, keepdims=True), approx=True)
    ctx = jnp.einsum("hqk,hkd->hqd", p.astype(jnp.bfloat16), v,
                     preferred_element_type=jnp.float32)
    ctx_ref[0] = ctx.astype(ctx_ref.dtype)


# ---------------------------------------------------------------------------
# Kernel 3: attention output projection + residual + position-wise FFN + residual.
# ---------------------------------------------------------------------------
def out_ffn_kernel(ctx_ref, x_ref, wo_ref, bo_ref, g2_ref, b2_ref,
                   w1_ref, bb1_ref, w2_ref, bb2_ref, o_ref):
    x = x_ref[0].astype(jnp.float32)                       # (tS, D)
    attn = jnp.dot(ctx_ref[0], wo_ref[...],
                   preferred_element_type=jnp.float32) + bo_ref[...]
    out = attn + x                                         # dropout == identity
    on = _layer_norm(out, g2_ref[...], b2_ref[...])
    inter = jnp.maximum(
        jnp.dot(on.astype(jnp.bfloat16), w1_ref[...],
                preferred_element_type=jnp.float32) + bb1_ref[...], 0.0)
    ff = jnp.dot(inter.astype(jnp.bfloat16), w2_ref[...],
                 preferred_element_type=jnp.float32) + bb2_ref[...]
    o_ref[0] = (ff + out).astype(o_ref.dtype)


def _pick_tile(n, target=128):
    """Largest multiple-of-8 divisor of n that is <= target (falls back to n itself)."""
    if n <= target:
        return n
    for t in range(target, 0, -8):
        if n % t == 0:
            return t
    return n


def _vmem_limit(nbytes):
    """1.5x headroom over the static working-set estimate, clamped to [16 MiB, 64 MiB] so the
    same setting is legal on v5e/v6e (128 MiB physical) and v7x (64 MiB physical)."""
    return int(min(max(int(nbytes * 1.5), 16 * 2**20), 64 * 2**20))


def transformer_encoder_layer(x, mask, params, heads):
    B, S, D = x.shape
    F = params["w1"].shape[1]
    dh = D // heads
    scale = 1.0 / math.sqrt(dh)

    # ---- parameter packing (wrapper-side) ----
    # fused QKV weight, attention scale folded into the Q projection, weights stored as bf16
    wqkv = jnp.concatenate(
        [params["wq"] * scale, params["wk"], params["wv"]], axis=1).astype(jnp.bfloat16)
    bqkv = jnp.concatenate(
        [params["bq"] * scale, params["bk"], params["bv"]], axis=1).astype(jnp.float32)
    wo = params["wo"].astype(jnp.bfloat16)
    w1 = params["w1"].astype(jnp.bfloat16)
    w2 = params["w2"].astype(jnp.bfloat16)

    # compact mask: bf16 instead of f32; (B, 1, S) / (B, S) key-padding masks accepted directly
    if mask.ndim == 2:
        mask = mask[:, None, :]
    mask_c = mask.astype(jnp.bfloat16)
    key_padding = mask_c.shape[1] == 1

    tS = _pick_tile(S)
    nS = S // tS
    parallel2 = ("parallel", "parallel")
    f32b, bf16b = 4, 2

    # ---------------- 1) LayerNorm + fused QKV projection ----------------
    est1 = 2 * (tS * D * x.dtype.itemsize + 2 * D * f32b + D * 3 * D * bf16b
                + 3 * D * f32b + tS * 3 * D * bf16b) + 2 * tS * 3 * D * f32b
    qkv = pl.pallas_call(
        ln_qkv_kernel,
        grid=(B, nS),
        in_specs=[
            pl.BlockSpec((1, tS, D), lambda b, r: (b, r, 0)),      # x
            pl.BlockSpec((1, D), lambda b, r: (0, 0)),             # ln1 gamma
            pl.BlockSpec((1, D), lambda b, r: (0, 0)),             # ln1 beta
            pl.BlockSpec((D, 3 * D), lambda b, r: (0, 0)),         # wqkv (bf16, resident)
            pl.BlockSpec((1, 3 * D), lambda b, r: (0, 0)),         # bqkv
        ],
        out_specs=pl.BlockSpec((1, tS, 3 * D), lambda b, r: (b, r, 0)),
        out_shape=jax.ShapeDtypeStruct((B, S, 3 * D), jnp.bfloat16),
        compiler_params=pltpu.CompilerParams(
            dimension_semantics=parallel2, vmem_limit_bytes=_vmem_limit(est1)),
    )(x, params["ln1_g"], params["ln1_b"], wqkv, bqkv)

    # QKV split + head split: (B, S, 3D) -> 3 x (B, H, S, dh).  Wrapper-side layout plumbing.
    def _split_heads(t):
        return t.reshape(B, S, heads, dh).transpose(0, 2, 1, 3)

    qh = _split_heads(qkv[:, :, :D])
    kh = _split_heads(qkv[:, :, D:2 * D])
    vh = _split_heads(qkv[:, :, 2 * D:])

    # ---------------- 2) multi-head attention ----------------
    if key_padding:
        m_spec = pl.BlockSpec((1, 1, S), lambda b, qi: (b, 0, 0))
        m_bytes = S * bf16b
    else:
        m_spec = pl.BlockSpec((1, tS, S), lambda b, qi: (b, qi, 0))
        m_bytes = tS * S * bf16b
    est2 = 2 * (heads * tS * dh * bf16b + 2 * heads * S * dh * bf16b + m_bytes
                + heads * tS * dh * bf16b) + 2 * heads * tS * S * f32b
    ctx_h = pl.pallas_call(
        attn_kernel,
        grid=(B, nS),
        in_specs=[
            pl.BlockSpec((1, heads, tS, dh), lambda b, qi: (b, 0, qi, 0)),  # q tile
            pl.BlockSpec((1, heads, S, dh), lambda b, qi: (b, 0, 0, 0)),    # k (resident per b)
            pl.BlockSpec((1, heads, S, dh), lambda b, qi: (b, 0, 0, 0)),    # v (resident per b)
            m_spec,
        ],
        out_specs=pl.BlockSpec((1, heads, tS, dh), lambda b, qi: (b, 0, qi, 0)),
        out_shape=jax.ShapeDtypeStruct((B, heads, S, dh), jnp.bfloat16),
        compiler_params=pltpu.CompilerParams(
            dimension_semantics=parallel2, vmem_limit_bytes=_vmem_limit(est2)),
    )(qh, kh, vh, mask_c)

    # head merge: (B, H, S, dh) -> (B, S, D)
    ctx = ctx_h.transpose(0, 2, 1, 3).reshape(B, S, D)

    # ---------------- 3) output projection + residual + FFN ----------------
    est3 = (2 * (tS * D * bf16b + tS * D * x.dtype.itemsize + D * D * bf16b
                 + D * F * bf16b + F * D * bf16b + (3 * D + F) * f32b + tS * D * f32b)
            + tS * F * f32b + 3 * tS * D * f32b)
    out = pl.pallas_call(
        out_ffn_kernel,
        grid=(B, nS),
        in_specs=[
            pl.BlockSpec((1, tS, D), lambda b, r: (b, r, 0)),      # ctx
            pl.BlockSpec((1, tS, D), lambda b, r: (b, r, 0)),      # x (residual)
            pl.BlockSpec((D, D), lambda b, r: (0, 0)),             # wo (bf16)
            pl.BlockSpec((1, D), lambda b, r: (0, 0)),             # bo
            pl.BlockSpec((1, D), lambda b, r: (0, 0)),             # ln2 gamma
            pl.BlockSpec((1, D), lambda b, r: (0, 0)),             # ln2 beta
            pl.BlockSpec((D, F), lambda b, r: (0, 0)),             # w1 (bf16)
            pl.BlockSpec((1, F), lambda b, r: (0, 0)),             # b1
            pl.BlockSpec((F, D), lambda b, r: (0, 0)),             # w2 (bf16)
            pl.BlockSpec((1, D), lambda b, r: (0, 0)),             # b2
        ],
        out_specs=pl.BlockSpec((1, tS, D), lambda b, r: (b, r, 0)),
        out_shape=jax.ShapeDtypeStruct((B, S, D), x.dtype),
        compiler_params=pltpu.CompilerParams(
            dimension_semantics=parallel2, vmem_limit_bytes=_vmem_limit(est3)),
    )(ctx, x, wo, params["bo"], params["ln2_g"], params["ln2_b"],
      w1, params["b1"], w2, params["b2"])
    return out


def reference_layer(x, mask, params, heads):
    """Pure-JAX f32 reference for correctness checking."""
    B, S, D = x.shape
    dh = D // heads
    if mask.ndim == 2:
        mask = mask[:, None, :]
    xn = _layer_norm(x, params["ln1_g"], params["ln1_b"])
    q = xn @ params["wq"] + params["bq"]
    k = xn @ params["wk"] + params["bk"]
    v = xn @ params["wv"] + params["bv"]

    def split(t):  # (B,S,D) -> (B,H,S,dh)
        return t.reshape(B, S, heads, dh).transpose(0, 2, 1, 3)

    qh, kh, vh = split(q) / math.sqrt(dh), split(k), split(v)
    s = jnp.einsum("bhqd,bhkd->bhqk", qh, kh)
    s = jnp.where(mask[:, None, :, :] > 0.5, -1e18, s)
    p = jax.nn.softmax(s, axis=-1)
    ctx = jnp.einsum("bhqk,bhkd->bhqd", p, vh).transpose(0, 2, 1, 3).reshape(B, S, D)
    out = ctx @ params["wo"] + params["bo"] + x
    on = _layer_norm(out, params["ln2_g"], params["ln2_b"])
    inter = jnp.maximum(on @ params["w1"] + params["b1"], 0.0)
    return inter @ params["w2"] + params["b2"] + out


def make_params(key, d_model, d_ff):
    ks = jax.random.split(key, 8)
    s = 0.1
    return {
        "ln1_g": jnp.ones((1, d_model), jnp.float32),
        "ln1_b": jnp.zeros((1, d_model), jnp.float32),
        "wq": s * jax.random.normal(ks[0], (d_model, d_model), jnp.float32),
        "bq": jnp.zeros((1, d_model), jnp.float32),
        "wk": s * jax.random.normal(ks[1], (d_model, d_model), jnp.float32),
        "bk": jnp.zeros((1, d_model), jnp.float32),
        "wv": s * jax.random.normal(ks[2], (d_model, d_model), jnp.float32),
        "bv": jnp.zeros((1, d_model), jnp.float32),
        "wo": s * jax.random.normal(ks[3], (d_model, d_model), jnp.float32),
        "bo": jnp.zeros((1, d_model), jnp.float32),
        "ln2_g": jnp.ones((1, d_model), jnp.float32),
        "ln2_b": jnp.zeros((1, d_model), jnp.float32),
        "w1": s * jax.random.normal(ks[4], (d_model, d_ff), jnp.float32),
        "b1": jnp.zeros((1, d_ff), jnp.float32),
        "w2": s * jax.random.normal(ks[5], (d_ff, d_model), jnp.float32),
        "b2": jnp.zeros((1, d_model), jnp.float32),
    }


if __name__ == "__main__":
    B, S, D, H, FF = 2, 8, 32, 4, 64
    key = jax.random.PRNGKey(0)
    kx, kp = jax.random.split(key, 2)

    x = jax.random.normal(kx, (B, S, D), jnp.float32)
    # padding mask: last 2 positions of batch element 1 are padded (1 == masked)
    pad = jnp.zeros((B, S), jnp.int32).at[1, -2:].set(1)
    mask_full = jnp.broadcast_to(pad[:, None, :], (B, S, S)).astype(jnp.int32)  # module contract
    params = make_params(kp, D, FF)

    fwd = jax.jit(transformer_encoder_layer, static_argnames=("heads",))

    out = jax.block_until_ready(fwd(x, mask_full, params, heads=H))
    ref = reference_layer(x, mask_full, params, heads=H)
    np.testing.assert_allclose(np.asarray(out), np.asarray(ref), rtol=5e-2, atol=5e-2)

    # compact (B, 1, S) key-padding mask path (avoids the dense (B, S, S) mask entirely)
    out_kp = jax.block_until_ready(fwd(x, pad[:, None, :], params, heads=H))
    np.testing.assert_allclose(np.asarray(out_kp), np.asarray(ref), rtol=5e-2, atol=5e-2)

    print("KERNEL_OK")
</pallas_src>

<mosaic_0001>
module attributes {stable_mosaic.version = 11 : i64} {
  func.func @ln_qkv_kernel(%arg0: i32, %arg1: i32, %arg2: memref<1x8x32xf32, #tpu.memory_space<vmem>>, %arg3: memref<1x32xf32, #tpu.memory_space<vmem>>, %arg4: memref<1x32xf32, #tpu.memory_space<vmem>>, %arg5: memref<32x96xbf16, #tpu.memory_space<vmem>>, %arg6: memref<1x96xf32, #tpu.memory_space<vmem>>, %arg7: memref<1x8x96xbf16, #tpu.memory_space<vmem>>) attributes {dimension_semantics = [#tpu.dimension_semantics<parallel>, #tpu.dimension_semantics<parallel>], iteration_bounds = array<i64: 2, 1>, scalar_prefetch = 0 : i64, scratch_operands = 0 : i64, tpu.core_type = #tpu.core_type<tc>, window_params = [{transform_indices = @transform_0, window_bounds = array<i64: 1, 8, 32>}, {pipeline_mode = #tpu.pipeline_mode<synchronous>, transform_indices = @transform_1, window_bounds = array<i64: 1, 32>}, {pipeline_mode = #tpu.pipeline_mode<synchronous>, transform_indices = @transform_2, window_bounds = array<i64: 1, 32>}, {pipeline_mode = #tpu.pipeline_mode<synchronous>, transform_indices = @transform_3, window_bounds = array<i64: 32, 96>}, {pipeline_mode = #tpu.pipeline_mode<synchronous>, transform_indices = @transform_4, window_bounds = array<i64: 1, 96>}, {transform_indices = @transform_5, window_bounds = array<i64: 1, 8, 96>}]} {
    %c0 = arith.constant 0 : index
    %c0_0 = arith.constant 0 : index
    %c0_1 = arith.constant 0 : index
    %0 = vector.load %arg2[%c0, %c0_0, %c0_1] : memref<1x8x32xf32, #tpu.memory_space<vmem>>, vector<1x8x32xf32>
    %1 = vector.shape_cast %0 : vector<1x8x32xf32> to vector<8x32xf32>
    %c0_2 = arith.constant 0 : index
    %c0_3 = arith.constant 0 : index
    %2 = vector.load %arg3[%c0_2, %c0_3] : memref<1x32xf32, #tpu.memory_space<vmem>>, vector<1x32xf32>
    %c0_4 = arith.constant 0 : index
    %c0_5 = arith.constant 0 : index
    %3 = vector.load %arg4[%c0_4, %c0_5] : memref<1x32xf32, #tpu.memory_space<vmem>>, vector<1x32xf32>
    %cst = arith.constant dense<0.000000e+00> : vector<8xf32>
    %4 = vector.multi_reduction <add>, %1, %cst [1] : vector<8x32xf32> to vector<8xf32>
    %5 = vector.shape_cast %4 : vector<8xf32> to vector<8x1xf32>
    %cst_6 = arith.constant 3.200000e+01 : f32
    %6 = vector.broadcast %cst_6 : f32 to vector<8x1xf32>
    %7 = arith.divf %5, %6 : vector<8x1xf32>
    %8 = vector.broadcast %7 : vector<8x1xf32> to vector<8x32xf32>
    %9 = arith.subf %1, %8 : vector<8x32xf32>
    %10 = arith.mulf %9, %9 : vector<8x32xf32>
    %cst_7 = arith.constant dense<0.000000e+00> : vector<8xf32>
    %11 = vector.multi_reduction <add>, %10, %cst_7 [1] : vector<8x32xf32> to vector<8xf32>
    %12 = vector.shape_cast %11 : vector<8xf32> to vector<8x1xf32>
    %cst_8 = arith.constant 3.200000e+01 : f32
    %13 = vector.broadcast %cst_8 : f32 to vector<8x1xf32>
    %14 = arith.divf %12, %13 : vector<8x1xf32>
    %15 = vector.broadcast %7 : vector<8x1xf32> to vector<8x32xf32>
    %16 = arith.subf %1, %15 : vector<8x32xf32>
    %cst_9 = arith.constant 9.99999997E-7 : f32
    %17 = vector.broadcast %cst_9 : f32 to vector<8x1xf32>
    %18 = arith.addf %14, %17 : vector<8x1xf32>
    %19 = math.rsqrt %18 : vector<8x1xf32>
    %20 = vector.broadcast %19 : vector<8x1xf32> to vector<8x32xf32>
    %21 = arith.mulf %16, %20 : vector<8x32xf32>
    %22 = vector.broadcast %2 : vector<1x32xf32> to vector<8x32xf32>
    %23 = arith.mulf %21, %22 : vector<8x32xf32>
    %24 = vector.broadcast %3 : vector<1x32xf32> to vector<8x32xf32>
    %25 = arith.addf %23, %24 : vector<8x32xf32>
    %26 = arith.truncf %25 : vector<8x32xf32> to vector<8x32xbf16>
    %c0_10 = arith.constant 0 : index
    %c0_11 = arith.constant 0 : index
    %27 = vector.load %arg5[%c0_10, %c0_11] : memref<32x96xbf16, #tpu.memory_space<vmem>>, vector<32x96xbf16>
    %cst_12 = arith.constant dense<0.000000e+00> : vector<8x96xf32>
    %28 = tpu.matmul %26, %27, %cst_12 {dimension_numbers = #tpu.dot_dimension_numbers<[1], [0], [0], [1], [0, 0, 1, 1], [], []>} : vector<8x32xbf16>, vector<32x96xbf16>, vector<8x96xf32> -> vector<8x96xf32>
    %c0_13 = arith.constant 0 : index
    %c0_14 = arith.constant 0 : index
    %29 = vector.load %arg6[%c0_13, %c0_14] : memref<1x96xf32, #tpu.memory_space<vmem>>, vector<1x96xf32>
    %30 = vector.broadcast %29 : vector<1x96xf32> to vector<8x96xf32>
    %31 = arith.addf %28, %30 : vector<8x96xf32>
    %32 = arith.truncf %31 : vector<8x96xf32> to vector<8x96xbf16>
    %c0_15 = arith.constant 0 : index
    %c0_16 = arith.constant 0 : index
    %c0_17 = arith.constant 0 : index
    %33 = vector.load %arg7[%c0_15, %c0_16, %c0_17] : memref<1x8x96xbf16, #tpu.memory_space<vmem>>, vector<1x8x96xbf16>
    %34 = vector.shape_cast %33 : vector<1x8x96xbf16> to vector<8x96xbf16>
    %35 = vector.shape_cast %32 : vector<8x96xbf16> to vector<1x8x96xbf16>
    tpu.vector_store %arg7[%c0_15, %c0_16, %c0_17], %35 {strides = array<i32>} : memref<1x8x96xbf16, #tpu.memory_space<vmem>>, vector<1x8x96xbf16>,
    return
  }
  func.func @transform_0(%arg0: i32, %arg1: i32) -> (i32, i32, i32) {
    %c0_i32 = arith.constant 0 : i32
    %c0_i32_0 = arith.constant 0 : i32
    return %arg0, %arg1, %c0_i32 : i32, i32, i32
  }
  func.func @transform_1(%arg0: i32, %arg1: i32) -> (i32, i32) {
    %c0_i32 = arith.constant 0 : i32
    %c0_i32_0 = arith.constant 0 : i32
    %c0_i32_1 = arith.constant 0 : i32
    return %c0_i32, %c0_i32_0 : i32, i32
  }
  func.func @transform_2(%arg0: i32, %arg1: i32) -> (i32, i32) {
    %c0_i32 = arith.constant 0 : i32
    %c0_i32_0 = arith.constant 0 : i32
    %c0_i32_1 = arith.constant 0 : i32
    return %c0_i32, %c0_i32_0 : i32, i32
  }
  func.func @transform_3(%arg0: i32, %arg1: i32) -> (i32, i32) {
    %c0_i32 = arith.constant 0 : i32
    %c0_i32_0 = arith.constant 0 : i32
    %c0_i32_1 = arith.constant 0 : i32
    return %c0_i32, %c0_i32_0 : i32, i32
  }
  func.func @transform_4(%arg0: i32, %arg1: i32) -> (i32, i32) {
    %c0_i32 = arith.constant 0 : i32
    %c0_i32_0 = arith.constant 0 : i32
    %c0_i32_1 = arith.constant 0 : i32
    return %c0_i32, %c0_i32_0 : i32, i32
  }
  func.func @transform_5(%arg0: i32, %arg1: i32) -> (i32, i32, i32) {
    %c0_i32 = arith.constant 0 : i32
    %c0_i32_0 = arith.constant 0 : i32
    return %arg0, %arg1, %c0_i32 : i32, i32, i32
  }
}

module attributes {stable_mosaic.version = 11 : i64} {
  func.func @attn_kernel(%arg0: i32, %arg1: i32, %arg2: memref<1x4x8x8xbf16, #tpu.memory_space<vmem>>, %arg3: memref<1x4x8x8xbf16, #tpu.memory_space<vmem>>, %arg4: memref<1x4x8x8xbf16, #tpu.memory_space<vmem>>, %arg5: memref<1x8x8xbf16, #tpu.memory_space<vmem>>, %arg6: memref<1x4x8x8xbf16, #tpu.memory_space<vmem>>) attributes {dimension_semantics = [#tpu.dimension_semantics<parallel>, #tpu.dimension_semantics<parallel>], iteration_bounds = array<i64: 2, 1>, scalar_prefetch = 0 : i64, scratch_operands = 0 : i64, tpu.core_type = #tpu.core_type<tc>, window_params = [{transform_indices = @transform_0, window_bounds = array<i64: 1, 4, 8, 8>}, {transform_indices = @transform_1, window_bounds = array<i64: 1, 4, 8, 8>}, {transform_indices = @transform_2, window_bounds = array<i64: 1, 4, 8, 8>}, {transform_indices = @transform_3, window_bounds = array<i64: 1, 8, 8>}, {transform_indices = @transform_4, window_bounds = array<i64: 1, 4, 8, 8>}]} {
    %c0 = arith.constant 0 : index
    %c0_0 = arith.constant 0 : index
    %c0_1 = arith.constant 0 : index
    %c0_2 = arith.constant 0 : index
    %0 = vector.load %arg2[%c0, %c0_0, %c0_1, %c0_2] : memref<1x4x8x8xbf16, #tpu.memory_space<vmem>>, vector<1x4x8x8xbf16>
    %1 = vector.shape_cast %0 : vector<1x4x8x8xbf16> to vector<4x8x8xbf16>
    %c0_3 = arith.constant 0 : index
    %c0_4 = arith.constant 0 : index
    %c0_5 = arith.constant 0 : index
    %c0_6 = arith.constant 0 : index
    %2 = vector.load %arg3[%c0_3, %c0_4, %c0_5, %c0_6] : memref<1x4x8x8xbf16, #tpu.memory_space<vmem>>, vector<1x4x8x8xbf16>
    %3 = vector.shape_cast %2 : vector<1x4x8x8xbf16> to vector<4x8x8xbf16>
    %c0_7 = arith.constant 0 : index
    %c0_8 = arith.constant 0 : index
    %c0_9 = arith.constant 0 : index
    %c0_10 = arith.constant 0 : index
    %4 = vector.load %arg4[%c0_7, %c0_8, %c0_9, %c0_10] : memref<1x4x8x8xbf16, #tpu.memory_space<vmem>>, vector<1x4x8x8xbf16>
    %5 = vector.shape_cast %4 : vector<1x4x8x8xbf16> to vector<4x8x8xbf16>
    "tpu.trace_start"() <{level = 10 : i32, message = "hqd,hkd->hqk"}> : () -> ()
    %cst = arith.constant dense<0.000000e+00> : vector<4x8x8xf32>
    %6 = tpu.matmul %1, %3, %cst {dimension_numbers = #tpu.dot_dimension_numbers<[2], [2], [1], [1], [0, 0, 0, 1, 1, 1], [0], [0]>} : vector<4x8x8xbf16>, vector<4x8x8xbf16>, vector<4x8x8xf32> -> vector<4x8x8xf32>
    "tpu.trace_stop"() : () -> ()
    %c0_11 = arith.constant 0 : index
    %c0_12 = arith.constant 0 : index
    %c0_13 = arith.constant 0 : index
    %7 = vector.load %arg5[%c0_11, %c0_12, %c0_13] : memref<1x8x8xbf16, #tpu.memory_space<vmem>>, vector<1x8x8xbf16>
    %8 = vector.shape_cast %7 : vector<1x8x8xbf16> to vector<8x8xbf16>
    %9 = arith.extf %8 : vector<8x8xbf16> to vector<8x8xf32>
    %cst_14 = arith.constant 5.000000e-01 : f32
    %10 = vector.broadcast %cst_14 : f32 to vector<8x8xf32>
    %11 = arith.cmpf ogt, %9, %10 : vector<8x8xf32>
    %cst_15 = arith.constant -9.99999984E+17 : f32
    %cst_16 = arith.constant 0.000000e+00 : f32
    %12 = vector.broadcast %cst_15 : f32 to vector<8x8xf32>
    %13 = vector.broadcast %cst_16 : f32 to vector<8x8xf32>
    %14 = arith.select %11, %12, %13 : vector<8x8xi1>, vector<8x8xf32>
    %15 = vector.shape_cast %14 : vector<8x8xf32> to vector<1x8x8xf32>
    %16 = vector.broadcast %15 : vector<1x8x8xf32> to vector<4x8x8xf32>
    %17 = arith.addf %6, %16 : vector<4x8x8xf32>
    %cst_17 = arith.constant dense<0xFF800000> : vector<4x8xf32>
    %18 = vector.multi_reduction <maximumf>, %17, %cst_17 [2] : vector<4x8x8xf32> to vector<4x8xf32>
    %19 = vector.shape_cast %18 : vector<4x8xf32> to vector<4x8x1xf32>
    %20 = vector.broadcast %19 : vector<4x8x1xf32> to vector<4x8x8xf32>
    %21 = arith.subf %17, %20 : vector<4x8x8xf32>
    %22 = math.exp %21 : vector<4x8x8xf32>
    %cst_18 = arith.constant dense<0.000000e+00> : vector<4x8xf32>
    %23 = vector.multi_reduction <add>, %22, %cst_18 [2] : vector<4x8x8xf32> to vector<4x8xf32>
    %24 = vector.shape_cast %23 : vector<4x8xf32> to vector<4x8x1xf32>
    %25 = tpu.reciprocal %24 {approx = true} : vector<4x8x1xf32> -> vector<4x8x1xf32>
    %26 = vector.broadcast %25 : vector<4x8x1xf32> to vector<4x8x8xf32>
    %27 = arith.mulf %22, %26 : vector<4x8x8xf32>
    %28 = arith.truncf %27 : vector<4x8x8xf32> to vector<4x8x8xbf16>
    "tpu.trace_start"() <{level = 10 : i32, message = "hqk,hkd->hqd"}> : () -> ()
    %cst_19 = arith.constant dense<0.000000e+00> : vector<4x8x8xf32>
    %29 = tpu.matmul %28, %5, %cst_19 {dimension_numbers = #tpu.dot_dimension_numbers<[2], [1], [1], [2], [0, 0, 0, 1, 1, 2], [0], [0]>} : vector<4x8x8xbf16>, vector<4x8x8xbf16>, vector<4x8x8xf32> -> vector<4x8x8xf32>
    "tpu.trace_stop"() : () -> ()
    %30 = arith.truncf %29 : vector<4x8x8xf32> to vector<4x8x8xbf16>
    %c0_20 = arith.constant 0 : index
    %c0_21 = arith.constant 0 : index
    %c0_22 = arith.constant 0 : index
    %c0_23 = arith.constant 0 : index
    %31 = vector.load %arg6[%c0_20, %c0_21, %c0_22, %c0_23] : memref<1x4x8x8xbf16, #tpu.memory_space<vmem>>, vector<1x4x8x8xbf16>
    %32 = vector.shape_cast %31 : vector<1x4x8x8xbf16> to vector<4x8x8xbf16>
    %33 = vector.shape_cast %30 : vector<4x8x8xbf16> to vector<1x4x8x8xbf16>
    tpu.vector_store %arg6[%c0_20, %c0_21, %c0_22, %c0_23], %33 {strides = array<i32>} : memref<1x4x8x8xbf16, #tpu.memory_space<vmem>>, vector<1x4x8x8xbf16>,
    return
  }
  func.func @transform_0(%arg0: i32, %arg1: i32) -> (i32, i32, i32, i32) {
    %c0_i32 = arith.constant 0 : i32
    %c0_i32_0 = arith.constant 0 : i32
    %c0_i32_1 = arith.constant 0 : i32
    return %arg0, %c0_i32, %arg1, %c0_i32_0 : i32, i32, i32, i32
  }
  func.func @transform_1(%arg0: i32, %arg1: i32) -> (i32, i32, i32, i32) {
    %c0_i32 = arith.constant 0 : i32
    %c0_i32_0 = arith.constant 0 : i32
    %c0_i32_1 = arith.constant 0 : i32
    %c0_i32_2 = arith.constant 0 : i32
    return %arg0, %c0_i32, %c0_i32_0, %c0_i32_1 : i32, i32, i32, i32
  }
  func.func @transform_2(%arg0: i32, %arg1: i32) -> (i32, i32, i32, i32) {
    %c0_i32 = arith.constant 0 : i32
    %c0_i32_0 = arith.constant 0 : i32
    %c0_i32_1 = arith.constant 0 : i32
    %c0_i32_2 = arith.constant 0 : i32
    return %arg0, %c0_i32, %c0_i32_0, %c0_i32_1 : i32, i32, i32, i32
  }
  func.func @transform_3(%arg0: i32, %arg1: i32) -> (i32, i32, i32) {
    %c0_i32 = arith.constant 0 : i32
    %c0_i32_0 = arith.constant 0 : i32
    return %arg0, %arg1, %c0_i32 : i32, i32, i32
  }
  func.func @transform_4(%arg0: i32, %arg1: i32) -> (i32, i32, i32, i32) {
    %c0_i32 = arith.constant 0 : i32
    %c0_i32_0 = arith.constant 0 : i32
    %c0_i32_1 = arith.constant 0 : i32
    return %arg0, %c0_i32, %arg1, %c0_i32_0 : i32, i32, i32, i32
  }
}

module attributes {stable_mosaic.version = 11 : i64} {
  func.func @out_ffn_kernel(%arg0: i32, %arg1: i32, %arg2: memref<1x8x32xbf16, #tpu.memory_space<vmem>>, %arg3: memref<1x8x32xf32, #tpu.memory_space<vmem>>, %arg4: memref<32x32xbf16, #tpu.memory_space<vmem>>, %arg5: memref<1x32xf32, #tpu.memory_space<vmem>>, %arg6: memref<1x32xf32, #tpu.memory_space<vmem>>, %arg7: memref<1x32xf32, #tpu.memory_space<vmem>>, %arg8: memref<32x64xbf16, #tpu.memory_space<vmem>>, %arg9: memref<1x64xf32, #tpu.memory_space<vmem>>, %arg10: memref<64x32xbf16, #tpu.memory_space<vmem>>, %arg11: memref<1x32xf32, #tpu.memory_space<vmem>>, %arg12: memref<1x8x32xf32, #tpu.memory_space<vmem>>) attributes {dimension_semantics = [#tpu.dimension_semantics<parallel>, #tpu.dimension_semantics<parallel>], iteration_bounds = array<i64: 2, 1>, scalar_prefetch = 0 : i64, scratch_operands = 0 : i64, tpu.core_type = #tpu.core_type<tc>, window_params = [{transform_indices = @transform_0, window_bounds = array<i64: 1, 8, 32>}, {transform_indices = @transform_1, window_bounds = array<i64: 1, 8, 32>}, {pipeline_mode = #tpu.pipeline_mode<synchronous>, transform_indices = @transform_2, window_bounds = array<i64: 32, 32>}, {pipeline_mode = #tpu.pipeline_mode<synchronous>, transform_indices = @transform_3, window_bounds = array<i64: 1, 32>}, {pipeline_mode = #tpu.pipeline_mode<synchronous>, transform_indices = @transform_4, window_bounds = array<i64: 1, 32>}, {pipeline_mode = #tpu.pipeline_mode<synchronous>, transform_indices = @transform_5, window_bounds = array<i64: 1, 32>}, {pipeline_mode = #tpu.pipeline_mode<synchronous>, transform_indices = @transform_6, window_bounds = array<i64: 32, 64>}, {pipeline_mode = #tpu.pipeline_mode<synchronous>, transform_indices = @transform_7, window_bounds = array<i64: 1, 64>}, {pipeline_mode = #tpu.pipeline_mode<synchronous>, transform_indices = @transform_8, window_bounds = array<i64: 64, 32>}, {pipeline_mode = #tpu.pipeline_mode<synchronous>, transform_indices = @transform_9, window_bounds = array<i64: 1, 32>}, {transform_indices = @transform_10, window_bounds = array<i64: 1, 8, 32>}]} {
    %c0 = arith.constant 0 : index
    %c0_0 = arith.constant 0 : index
    %c0_1 = arith.constant 0 : index
    %0 = vector.load %arg3[%c0, %c0_0, %c0_1] : memref<1x8x32xf32, #tpu.memory_space<vmem>>, vector<1x8x32xf32>
    %1 = vector.shape_cast %0 : vector<1x8x32xf32> to vector<8x32xf32>
    %c0_2 = arith.constant 0 : index
    %c0_3 = arith.constant 0 : index
    %c0_4 = arith.constant 0 : index
    %2 = vector.load %arg2[%c0_2, %c0_3, %c0_4] : memref<1x8x32xbf16, #tpu.memory_space<vmem>>, vector<1x8x32xbf16>
    %3 = vector.shape_cast %2 : vector<1x8x32xbf16> to vector<8x32xbf16>
    %c0_5 = arith.constant 0 : index
    %c0_6 = arith.constant 0 : index
    %4 = vector.load %arg4[%c0_5, %c0_6] : memref<32x32xbf16, #tpu.memory_space<vmem>>, vector<32x32xbf16>
    %cst = arith.constant dense<0.000000e+00> : vector<8x32xf32>
    %5 = tpu.matmul %3, %4, %cst {dimension_numbers = #tpu.dot_dimension_numbers<[1], [0], [0], [1], [0, 0, 1, 1], [], []>} : vector<8x32xbf16>, vector<32x32xbf16>, vector<8x32xf32> -> vector<8x32xf32>
    %c0_7 = arith.constant 0 : index
    %c0_8 = arith.constant 0 : index
    %6 = vector.load %arg5[%c0_7, %c0_8] : memref<1x32xf32, #tpu.memory_space<vmem>>, vector<1x32xf32>
    %7 = vector.broadcast %6 : vector<1x32xf32> to vector<8x32xf32>
    %8 = arith.addf %5, %7 : vector<8x32xf32>
    %9 = arith.addf %8, %1 : vector<8x32xf32>
    %c0_9 = arith.constant 0 : index
    %c0_10 = arith.constant 0 : index
    %10 = vector.load %arg6[%c0_9, %c0_10] : memref<1x32xf32, #tpu.memory_space<vmem>>, vector<1x32xf32>
    %c0_11 = arith.constant 0 : index
    %c0_12 = arith.constant 0 : index
    %11 = vector.load %arg7[%c0_11, %c0_12] : memref<1x32xf32, #tpu.memory_space<vmem>>, vector<1x32xf32>
    %cst_13 = arith.constant dense<0.000000e+00> : vector<8xf32>
    %12 = vector.multi_reduction <add>, %9, %cst_13 [1] : vector<8x32xf32> to vector<8xf32>
    %13 = vector.shape_cast %12 : vector<8xf32> to vector<8x1xf32>
    %cst_14 = arith.constant 3.200000e+01 : f32
    %14 = vector.broadcast %cst_14 : f32 to vector<8x1xf32>
    %15 = arith.divf %13, %14 : vector<8x1xf32>
    %16 = vector.broadcast %15 : vector<8x1xf32> to vector<8x32xf32>
    %17 = arith.subf %9, %16 : vector<8x32xf32>
    %18 = arith.mulf %17, %17 : vector<8x32xf32>
    %cst_15 = arith.constant dense<0.000000e+00> : vector<8xf32>
    %19 = vector.multi_reduction <add>, %18, %cst_15 [1] : vector<8x32xf32> to vector<8xf32>
    %20 = vector.shape_cast %19 : vector<8xf32> to vector<8x1xf32>
    %cst_16 = arith.constant 3.200000e+01 : f32
    %21 = vector.broadcast %cst_16 : f32 to vector<8x1xf32>
    %22 = arith.divf %20, %21 : vector<8x1xf32>
    %23 = vector.broadcast %15 : vector<8x1xf32> to vector<8x32xf32>
    %24 = arith.subf %9, %23 : vector<8x32xf32>
    %cst_17 = arith.constant 9.99999997E-7 : f32
    %25 = vector.broadcast %cst_17 : f32 to vector<8x1xf32>
    %26 = arith.addf %22, %25 : vector<8x1xf32>
    %27 = math.rsqrt %26 : vector<8x1xf32>
    %28 = vector.broadcast %27 : vector<8x1xf32> to vector<8x32xf32>
    %29 = arith.mulf %24, %28 : vector<8x32xf32>
    %30 = vector.broadcast %10 : vector<1x32xf32> to vector<8x32xf32>
    %31 = arith.mulf %29, %30 : vector<8x32xf32>
    %32 = vector.broadcast %11 : vector<1x32xf32> to vector<8x32xf32>
    %33 = arith.addf %31, %32 : vector<8x32xf32>
    %34 = arith.truncf %33 : vector<8x32xf32> to vector<8x32xbf16>
    %c0_18 = arith.constant 0 : index
    %c0_19 = arith.constant 0 : index
    %35 = vector.load %arg8[%c0_18, %c0_19] : memref<32x64xbf16, #tpu.memory_space<vmem>>, vector<32x64xbf16>
    %cst_20 = arith.constant dense<0.000000e+00> : vector<8x64xf32>
    %36 = tpu.matmul %34, %35, %cst_20 {dimension_numbers = #tpu.dot_dimension_numbers<[1], [0], [0], [1], [0, 0, 1, 1], [], []>} : vector<8x32xbf16>, vector<32x64xbf16>, vector<8x64xf32> -> vector<8x64xf32>
    %c0_21 = arith.constant 0 : index
    %c0_22 = arith.constant 0 : index
    %37 = vector.load %arg9[%c0_21, %c0_22] : memref<1x64xf32, #tpu.memory_space<vmem>>, vector<1x64xf32>
    %38 = vector.broadcast %37 : vector<1x64xf32> to vector<8x64xf32>
    %39 = arith.addf %36, %38 : vector<8x64xf32>
    %cst_23 = arith.constant 0.000000e+00 : f32
    %40 = vector.broadcast %cst_23 : f32 to vector<8x64xf32>
    %41 = arith.maximumf %39, %40 : vector<8x64xf32>
    %42 = arith.truncf %41 : vector<8x64xf32> to vector<8x64xbf16>
    %c0_24 = arith.constant 0 : index
    %c0_25 = arith.constant 0 : index
    %43 = vector.load %arg10[%c0_24, %c0_25] : memref<64x32xbf16, #tpu.memory_space<vmem>>, vector<64x32xbf16>
    %cst_26 = arith.constant dense<0.000000e+00> : vector<8x32xf32>
    %44 = tpu.matmul %42, %43, %cst_26 {dimension_numbers = #tpu.dot_dimension_numbers<[1], [0], [0], [1], [0, 0, 1, 1], [], []>} : vector<8x64xbf16>, vector<64x32xbf16>, vector<8x32xf32> -> vector<8x32xf32>
    %c0_27 = arith.constant 0 : index
    %c0_28 = arith.constant 0 : index
    %45 = vector.load %arg11[%c0_27, %c0_28] : memref<1x32xf32, #tpu.memory_space<vmem>>, vector<1x32xf32>
    %46 = vector.broadcast %45 : vector<1x32xf32> to vector<8x32xf32>
    %47 = arith.addf %44, %46 : vector<8x32xf32>
    %48 = arith.addf %47, %9 : vector<8x32xf32>
    %c0_29 = arith.constant 0 : index
    %c0_30 = arith.constant 0 : index
    %c0_31 = arith.constant 0 : index
    %49 = vector.load %arg12[%c0_29, %c0_30, %c0_31] : memref<1x8x32xf32, #tpu.memory_space<vmem>>, vector<1x8x32xf32>
    %50 = vector.shape_cast %49 : vector<1x8x32xf32> to vector<8x32xf32>
    %51 = vector.shape_cast %48 : vector<8x32xf32> to vector<1x8x32xf32>
    tpu.vector_store %arg12[%c0_29, %c0_30, %c0_31], %51 {strides = array<i32>} : memref<1x8x32xf32, #tpu.memory_space<vmem>>, vector<1x8x32xf32>,
    return
  }
  func.func @transform_0(%arg0: i32, %arg1: i32) -> (i32, i32, i32) {
    %c0_i32 = arith.constant 0 : i32
    %c0_i32_0 = arith.constant 0 : i32
    return %arg0, %arg1, %c0_i32 : i32, i32, i32
  }
  func.func @transform_1(%arg0: i32, %arg1: i32) -> (i32, i32, i32) {
    %c0_i32 = arith.constant 0 : i32
    %c0_i32_0 = arith.constant 0 : i32
    return %arg0, %arg1, %c0_i32 : i32, i32, i32
  }
  func.func @transform_2(%arg0: i32, %arg1: i32) -> (i32, i32) {
    %c0_i32 = arith.constant 0 : i32
    %c0_i32_0 = arith.constant 0 : i32
    %c0_i32_1 = arith.constant 0 : i32
    return %c0_i32, %c0_i32_0 : i32, i32
  }
  func.func @transform_3(%arg0: i32, %arg1: i32) -> (i32, i32) {
    %c0_i32 = arith.constant 0 : i32
    %c0_i32_0 = arith.constant 0 : i32
    %c0_i32_1 = arith.constant 0 : i32
    return %c0_i32, %c0_i32_0 : i32, i32
  }
  func.func @transform_4(%arg0: i32, %arg1: i32) -> (i32, i32) {
    %c0_i32 = arith.constant 0 : i32
    %c0_i32_0 = arith.constant 0 : i32
    %c0_i32_1 = arith.constant 0 : i32
    return %c0_i32, %c0_i32_0 : i32, i32
  }
  func.func @transform_5(%arg0: i32, %arg1: i32) -> (i32, i32) {
    %c0_i32 = arith.constant 0 : i32
    %c0_i32_0 = arith.constant 0 : i32
    %c0_i32_1 = arith.constant 0 : i32
    return %c0_i32, %c0_i32_0 : i32, i32
  }
  func.func @transform_6(%arg0: i32, %arg1: i32) -> (i32, i32) {
    %c0_i32 = arith.constant 0 : i32
    %c0_i32_0 = arith.constant 0 : i32
    %c0_i32_1 = arith.constant 0 : i32
    return %c0_i32, %c0_i32_0 : i32, i32
  }
  func.func @transform_7(%arg0: i32, %arg1: i32) -> (i32, i32) {
    %c0_i32 = arith.constant 0 : i32
    %c0_i32_0 = arith.constant 0 : i32
    %c0_i32_1 = arith.constant 0 : i32
    return %c0_i32, %c0_i32_0 : i32, i32
  }
  func.func @transform_8(%arg0: i32, %arg1: i32) -> (i32, i32) {
    %c0_i32 = arith.constant 0 : i32
    %c0_i32_0 = arith.constant 0 : i32
    %c0_i32_1 = arith.constant 0 : i32
    return %c0_i32, %c0_i32_0 : i32, i32
  }
  func.func @transform_9(%arg0: i32, %arg1: i32) -> (i32, i32) {
    %c0_i32 = arith.constant 0 : i32
    %c0_i32_0 = arith.constant 0 : i32
    %c0_i32_1 = arith.constant 0 : i32
    return %c0_i32, %c0_i32_0 : i32, i32
  }
  func.func @transform_10(%arg0: i32, %arg1: i32) -> (i32, i32, i32) {
    %c0_i32 = arith.constant 0 : i32
    %c0_i32_0 = arith.constant 0 : i32
    return %arg0, %arg1, %c0_i32 : i32, i32, i32
  }
}

</mosaic_0001>

<bundles_post_ra>
// kernel: transformer_encoder_layer.3
= control target key start
LH: loop header
LB: loop body
LE: loop exit
PB: predicated region body
PF: predicated region fallthrough
CT: control target
= control target key end

     0   :  { %s540_s18 = smov 0   ;;  %s542_s19 = smov 0   ;;  %s595_s0 = inlined_call_operand.vmem [shape: f32[2,8,32], index: 0, kind: input, shape index: {}]   ;;  %s596_s1 = inlined_call_operand.vmem [shape: f32[1,32], index: 1, kind: input, shape index: {}]   ;;  %s597_s2 = inlined_call_operand.vmem [shape: f32[1,32], index: 2, kind: input, shape index: {}]   ;;  %s598_s3 = inlined_call_operand.vmem [shape: bf16[32,96], index: 3, kind: input, shape index: {}]   ;;  %s599_s4 = inlined_call_operand.vmem [shape: f32[1,96], index: 4, kind: input, shape index: {}]   ;;  %s600_s5 = inlined_call_operand.vmem [shape: bf16[2,8,96], index: 5, kind: output, shape index: {}]  }
   0x1   :  { %s544_s20 = smov 0  }
   0x2 LB: > { %s27_s21 = sadd.s32 1, %s502_s19  ;;  %p432_p0 = scmp.ge.s32.totalorder %s506_s20, 1  ;;  %s506_s20 = sphi %s544_s20, %s15_s20   ;;  %s502_s19 = sphi %s542_s19, %s602_s19   ;;  %s498_s18 = sphi %s540_s18, %s601_s18  }
   0x3   : > { %p29_p1 = scmp.ge.s32.totalorder %s27_s21, 2  ;;  %p205_p2 = scmp.lt.s32.totalorder %s506_s20, 3 }
   0x5   : > { %s604_s21 = smov (%p29_p1, %s27_s21), 0  ;;  %p206_p3 = pnand %p432_p0, %p205_p2 }
   0x6   : > { %p237_p4 = scmp.lt.s32.totalorder (!%p206_p3), %s498_s18, 1 }
   0x7   : > { %209 = sbr.rel (%p206_p3) target bundleno = 525 (0x20d), region = 40 }
   0xc   : > { %s606_s18 = smov (!%p237_p4, %s498_s18), 1  ;;  %vm255_vm0 = vcmask 261120   ;;  %v480_v7 = vld [vmem:[%s598_s3 + $0x8] sm:$0xff]   ;;  %v508_v8 = vmov 0.0   ;;  %vm509_vm1 = vmmov 0   ;;  %v481_v9 = vld [vmem:[%s598_s3] sm:$0xff]  }
   0xd   : > { %s433_s22 = sshll.u32 %s606_s18, 3  ;;  %446 = vmatprep.subr.bf16.mxu0 %v508_v8  ;;  %450 = vmatprep.mubr.msk.bf16.mxu0 %vm509_vm1, %v508_v8  ;;  %v435_v14 = vld [vmem:[%s596_s1] ss:$0 sm:$0xff]  ;;  %s434_s11 = sshll.u32 %s606_s18, 2  ;;  %vm352_vm2 = vcmask 781312  }
   0xe   : > { %s243_s25 = scalar_lea.vmem %s595_s0, %s433_s22  ;;  %447 = vmatpush3.bf16.msra.mxu0 %v480_v7  ;;  %v436_v16 = vld [vmem:[%s597_s2] ss:$0 sm:$0xff]  ;;  %s250_s14 = scalar_lea.vmem %s600_s5, %s434_s11 }
   0xf   : > { %v252_v0 = vld [vmem:[%s243_s25] sm:$0xff]  ;;  %448 = vmatprep.subr.bf16.mxu0 %v508_v8 }
  0x10   : > { %v256_v1 = vsel %vm255_vm0, %v252_v0, 0.0  ;;  %v437_v20 = vld [vmem:[%s599_s4] ss:$0 sm:$0xff] }
  0x11   : > { %257 = vadd.xlane.f32.xlu0 %v256_v1 }
  0x12   : > { %449 = vmatpush3.bf16.msra.mxu0 %v481_v9 }
  0x9a   : > { %v258_v2 = vpop.xlane.xlu0 %257 }
  0x9b   : > { %v260_v3 = vmul.f32 0.03125, %v258_v2 }
  0x9d   : > { %v261_v4 = vsub.f32 %v252_v0, %v260_v3 }
  0x9f   : > { %v262_v5 = vmul.f32 %v261_v4, %v261_v4 }
  0xa1   : > { %v263_v6 = vsel %vm255_vm0, %v262_v5, 0.0 }
  0xa2   : > { %264 = vadd.xlane.f32.xlu0 %v263_v6 }
 0x12b   : > { %v265_v10 = vpop.xlane.xlu0 %264 }
 0x12c   : > { %v266_v11 = vmul.f32 0.03125, %v265_v10 }
 0x12e   : > { %v267_v12 = vadd.f32 1e-06, %v266_v11 }
 0x130   : > { %482 = vrsqrt.f32 %v267_v12 }
 0x13d   : > { %v483_v13 = vpop.eup %482 }
 0x13e   : > { %v269_v15 = vmul.f32 %v483_v13, %v261_v4 }
 0x140   : > { %v276_v17 = vmul.f32 %v435_v14, %v269_v15 }
 0x142   : > { %v283_v18 = vadd.f32 %v436_v16, %v276_v17 }
 0x144   : > { %v284_v19 = vpack.c.bf16 %v283_v18, %v283_v18 }
 0x146   : > { %451 = vmatmul.mubr.msk.bf16.vlgmr.msra.gmra.mxu0 %vm255_vm0, %v284_v19 }
 0x206   : > { %v345_v21 = vpop.f32.mrf.mxu0 }
 0x207   : > { %v346_v22 = vadd.f32 %v437_v20, %v345_v21 }
 0x208   : > { %v452_v23 = vpop.f32.mrf.mxu0 }
 0x209   : > { %v351_v24 = vpack.c.bf16 %v346_v22, %v346_v22 }
 0x20a   : > { %v348_v25 = vpop.f32.mrf.mxu0 }
 0x20b   : > { %353 = vst.msk [vmem:[%s250_s14] sm:$0xf] %vm352_vm2, %v351_v24 }
 0x20c   : > { %v453_v26 = vpop.f32.mrf.mxu0 }
 0x20d PF: > { %s15_s20 = sadd.s32 1, %s506_s20   ;;  %s601_s18 = smov %s502_s19 }
 0x20e   : > { %p12_p5 = scmp.ge.s32.totalorder %s15_s20, 4   ;;  %s602_s19 = smov %s604_s21 }
 0x210   :  { %14 = sbr.rel (!%p12_p5) target bundleno = 2 (0x2), region = 70 }

// kernel: transformer_encoder_layer.5
= control target key start
LH: loop header
LB: loop body
LE: loop exit
PB: predicated region body
PF: predicated region fallthrough
CT: control target
= control target key end

     0   :  { %s1192_s0 = inlined_call_operand.vmem [shape: bf16[2,8,32], index: 0, kind: input, shape index: {}]   ;;  %s1193_s1 = inlined_call_operand.vmem [shape: f32[2,8,32], index: 1, kind: input, shape index: {}]   ;;  %s1194_s2 = inlined_call_operand.vmem [shape: bf16[32,32], index: 2, kind: input, shape index: {}]   ;;  %s1195_s3 = inlined_call_operand.vmem [shape: f32[1,32], index: 3, kind: input, shape index: {}]   ;;  %s1196_s4 = inlined_call_operand.vmem [shape: f32[1,32], index: 4, kind: input, shape index: {}]   ;;  %s1197_s5 = inlined_call_operand.vmem [shape: f32[1,32], index: 5, kind: input, shape index: {}]   ;;  %s1198_s6 = inlined_call_operand.vmem [shape: bf16[32,64], index: 6, kind: input, shape index: {}]   ;;  %s1199_s7 = inlined_call_operand.vmem [shape: f32[1,64], index: 7, kind: input, shape index: {}]   ;;  %s1200_s8 = inlined_call_operand.vmem [shape: bf16[64,32], index: 8, kind: input, shape index: {}]   ;;  %s1201_s9 = inlined_call_operand.vmem [shape: f32[1,32], index: 9, kind: input, shape index: {}]   ;;  %s1202_s10 = inlined_call_operand.hbm [shape: f32[2,8,32], index: 10, kind: output, shape index: {}]  }
   0x1   :  { %1203 = sst [smem:[#allocation5_spill]] %s1194_s2 }
   0x2   :  { %15 = vsyncpa [#allocation3], 0 }
   0x3   :  { %17 = vsyncpa [#allocation3 + $0x1], 0  ;;  %s1034_s13 = smov 0   ;;  %s1036_s14 = smov 0  }
   0x4   :  { %s1038_s15 = smov 0   ;;  %s1040_s16 = smov 0  }
   0x5   :  { %s1042_s17 = smov 0   ;;  %s1044_s18 = smov 0  }
   0x6 LB: > { %s764_s19 = sadd.s32 4294967295, %s974_s18   ;;  %s765_s20 = sadd.s32 4294967294, %s974_s18   ;;  %s974_s18 = sphi %s1044_s18, %s23_s18   ;;  %s970_s17 = sphi %s1042_s17, %s1211_s17   ;;  %s966_s16 = sphi %s1040_s16, %s1210_s16   ;;  %s962_s15 = sphi %s1038_s15, %s1209_s15   ;;  %s958_s14 = sphi %s1036_s14, %s1208_s14   ;;  %s954_s13 = sphi %s1034_s13, %s1207_s13  }
   0x7   : > { %s35_s21 = sadd.s32 1, %s970_s17  ;;  %s268_s22 = sadd.s32 1, %s962_s15 }
   0x8   : > { %p37_p0 = scmp.ge.s32.totalorder %s35_s21, 2  ;;  %p278_p1 = scmp.ne.s32.totalorder %s962_s15, %s958_s14 }
   0x9   : > { %p279_p2 = scmp.eq.s32.totalorder %s764_s19, 1  ;;  %p284_p3 = scmp.ne.s32.totalorder %s958_s14, %s954_s13 }
   0xa   : > { %s1213_s21 = smov (%p37_p0, %s35_s21), 0  ;;  %p285_p5 = scmp.eq.s32.totalorder %s765_s20, 1 }
   0xb   : > { %p1074_p4 = por %p279_p2, %p278_p1  ;;  %s263_s24 = ssub.s32 %s970_s17, %s1213_s21 }
   0xc   : > { %p768_p6 = scmp.ge.s32.totalorder %s974_s18, 1  ;;  %p266_p7 = scmp.eq.s32.totalorder %s263_s24, 0 }
   0xd   : > { %p1081_p8 = por %p285_p5, %p284_p3  ;;  %p347_p9 = scmp.lt.s32.totalorder %s974_s18, 3 }
   0xe   : > { %s1087_s26 = scalar_select %p266_p7, %s962_s15, %s268_s22  }
   0xf   : > { %p348_p10 = pnand %p768_p6, %p347_p9 }
  0x10   : > { %s1206_s2 = sld [smem:[#allocation5_spill]] (!%p348_p10)  ;;  %p394_p11 = scmp.lt.s32.totalorder (!%p348_p10), %s966_s16, 1 }
  0x11   : > { %351 = sbr.rel (%p348_p10) target bundleno = 948 (0x3b4), region = 60  ;;  %s391_s27 = sand.u32 (!%p348_p10), 1, %s958_s14  }
  0x12   : > { %s769_s28 = sshll.u32 (!%p348_p10), %s391_s27, 3 }
  0x16   : > { %v888_v0 = vld [vmem:[%s1206_s2 + $0x8] sm:$0xff]   ;;  %v976_v1 = vmov 0.0   ;;  %v889_v2 = vld [vmem:[%s1206_s2] sm:$0xff]   ;;  %vm977_vm0 = vmmov 0   ;;  %s395_s11 = scalar_select %p394_p11, %s966_s16, 1  ;;  %vm434_vm1 = vcmask 261120  }
  0x17   : > { %803 = vmatprep.subr.bf16.mxu1 %v976_v1  ;;  %819 = vmatprep.subr.bf16.mxu0 %v976_v1  ;;  %v772_v4 = vld [vmem:[%s1195_s3] ss:$0 sm:$0xff]  ;;  %v890_v18 = vld [vmem:[%s1198_s6 + $0x8] sm:$0xff]   ;;  %v892_v20 = vld [vmem:[%s1200_s8 + $0x18] sm:$0xff]   ;;  %vm617_vm2 = vcmask 523264   ;;  %s393_s2 = scalar_lea.vmem [#allocation2], %s769_s28 }
  0x18   : > { %804 = vmatpush3.bf16.msra.mxu1 %v888_v0  ;;  %807 = vmatprep.mubr.msk.bf16.mxu1 %vm977_vm0, %v976_v1  ;;  %s770_s12 = sshll.u32 %s395_s11, 2  ;;  %s771_s24 = sshll.u32 %s395_s11, 3  ;;  %v891_v19 = vld [vmem:[%s1198_s6] sm:$0xff]   ;;  %v893_v21 = vld [vmem:[%s1200_s8 + $0x10] sm:$0xff]   ;;  %v894_v32 = vld [vmem:[%s1200_s8 + $0x8] sm:$0xff]  }
  0x19   : > { %805 = vmatprep.subr.bf16.mxu1 %v976_v1  ;;  %827 = vmatprep.mubr.msk.bf16.mxu0 %vm977_vm0, %v976_v1  ;;  %s400_s22 = scalar_lea.vmem %s1192_s0, %s770_s12  ;;  %s407_s29 = scalar_lea.vmem %s1193_s1, %s771_s24  ;;  %v776_v26 = vld [vmem:[%s1196_s4] ss:$0 sm:$0xff] }
  0x1a   : > { %v410_v3 = vld [vmem:[%s400_s22] sm:$0xf]  ;;  %820 = vmatpush3.bf16.msra.mxu0 %v892_v20  ;;  %s789_s11 = sshll.u32 %s966_s16, 7  ;;  %s678_s12 = sshll.u32 %s393_s2, 4  ;;  %s1147_s12 = int_to_ptr.vmem [resolvable:$true] %s678_s12 }
  0x1b   : > { %v409_v5 = vld [vmem:[%s407_s29] sm:$0xff]  ;;  %821 = vmatprep.subr.bf16.mxu0 %v976_v1  ;;  %s1145_s22 = scalar_lea.hbm %s1202_s10, %s789_s11  ;;  %s664_s16 = scalar_lea.sflag [#allocation3], %s391_s27 }
  0x1c   : > { %806 = vmatpush3.bf16.msra.mxu1 %v889_v2  ;;  %v777_v28 = vld [vmem:[%s1197_s5] ss:$0 sm:$0xff]  ;;  %s898_s24 = scalar_lea.vmem %s1147_s12, 128  ;;  %s978_s28 = smov [#allocation2]  }
  0x1d   : > { %811 = vmatprep.subr.bf16.mxu1 %v976_v1  ;;  %v895_v33 = vld [vmem:[%s1200_s8] sm:$0xff]   ;;  %p899_p12 = scmp.ne.s32.totalorder %s1147_s12, %s898_s24  ;;  %s902_s29 = sshll.u32 %s978_s28, 4  ;;  %s903_s29 = int_to_ptr.vmem [resolvable:$false] %s902_s29 }
  0x1e   : > { %822 = vmatpush3.bf16.msra.mxu0 %v893_v21  ;;  %v778_v34 = vld [vmem:[%s1199_s7] ss:$0 sm:$0xff]  ;;  %s904_s30 = scalar_lea.vmem %s903_s29, 256  ;;  %p905_p1 = scmp.lt.s32.totalorder %s1147_s12, %s903_s29 }
  0x1f   : > { %808 = vmatmul.mubr.msk.bf16.vlgmr.msra.gmra.mxu1 %vm434_vm1, %v410_v3  ;;  %823 = vmatprep.subr.bf16.mxu0 %v976_v1  ;;  %v782_v42 = vld [vmem:[%s1201_s9] ss:$0 sm:$0xff]  ;;  %p900_p13 = pnand %p899_p12, %p1074_p4  ;;  %p906_p2 = scmp.lt.s32.totalorder %s904_s30, %s898_s24 }
  0x20   : > { %815 = vmatprep.mubr.msk.bf16.mxu1 %vm977_vm0, %v976_v1  ;;  %812 = vmatpush3.bf16.msra.mxu1 %v890_v18 }
  0x21   : > { %813 = vmatprep.subr.bf16.mxu1 %v976_v1  ;;  %p901_p0 = pneg %p900_p13  ;;  %p907_p3 = por %p906_p2, %p905_p1 }
  0x22   : > { %824 = vmatpush3.bf16.msra.mxu0 %v894_v32 }
  0x23   : > { %825 = vmatprep.subr.bf16.mxu0 %v976_v1  ;;  %p908_p5 = pnand %p907_p3, %p901_p0 }
  0x24   : > { %814 = vmatpush3.bf16.msra.mxu1 %v891_v19 }
  0x26   : > { %826 = vmatpush3.bf16.msra.mxu0 %v895_v33 }
  0xdf   : > { %v472_v6 = vpop.f32.mrf.mxu1 }
  0xe0   : > { %v473_v7 = vadd.f32 %v772_v4, %v472_v6 }
  0xe1   : > { %v809_v8 = vpop.f32.mrf.mxu1 }
  0xe2   : > { %v478_v9 = vadd.f32 %v473_v7, %v409_v5 }
  0xe3   : > { %v475_v10 = vpop.f32.mrf.mxu1 }
  0xe4   : > { %v481_v11 = vsel %vm434_vm1, %v478_v9, 0.0 }
  0xe5   : > { %482 = vadd.xlane.f32.xlu0 %v481_v11  ;;  %v810_v12 = vpop.f32.mrf.mxu1 }
 0x16e   : > { %v483_v13 = vpop.xlane.xlu0 %482 }
 0x16f   : > { %v485_v14 = vmul.f32 0.03125, %v483_v13 }
 0x171   : > { %v486_v15 = vsub.f32 %v478_v9, %v485_v14 }
 0x173   : > { %v487_v16 = vmul.f32 %v486_v15, %v486_v15 }
 0x175   : > { %v488_v17 = vsel %vm434_vm1, %v487_v16, 0.0 }
 0x176   : > { %489 = vadd.xlane.f32.xlu0 %v488_v17 }
 0x1ff   : > { %v490_v22 = vpop.xlane.xlu0 %489 }
 0x200   : > { %v491_v23 = vmul.f32 0.03125, %v490_v22 }
 0x202   : > { %v492_v24 = vadd.f32 1e-06, %v491_v23 }
 0x204   : > { %896 = vrsqrt.f32 %v492_v24 }
 0x211   : > { %v897_v25 = vpop.eup %896 }
 0x212   : > { %v494_v27 = vmul.f32 %v897_v25, %v486_v15 }
 0x214   : > { %v501_v29 = vmul.f32 %v776_v26, %v494_v27 }
 0x216   : > { %v508_v30 = vadd.f32 %v777_v28, %v501_v29 }
 0x218   : > { %v509_v31 = vpack.c.bf16 %v508_v30, %v508_v30 }
 0x21a   : > { %816 = vmatmul.mubr.msk.bf16.vlgmr.msra.gmra.mxu1 %vm434_vm1, %v509_v31 }
 0x2da   : > { %v570_v35 = vpop.f32.mrf.mxu1 }
 0x2db   : > { %v571_v36 = vadd.f32 %v778_v34, %v570_v35 }
 0x2dc   : > { %v817_v37 = vpop.f32.mrf.mxu1 }
 0x2dd   : > { %v576_v38 = vmax.f32 %v571_v36, 0.0 }
 0x2de   : > { %v573_v39 = vpop.f32.mrf.mxu1 }
 0x2df   : > { %v577_v40 = vpack.c.bf16 %v576_v38, %v576_v38 }
 0x2e0   : > { %v818_v41 = vpop.f32.mrf.mxu1 }
 0x2e1   : > { %828 = vmatmul.mubr.msk.bf16.vlgmr.msra.gmra.mxu0 %vm617_vm2, %v577_v40 }
 0x3a1   : > { %v655_v43 = vpop.f32.mrf.mxu0 }
 0x3a2   : > { %v656_v44 = vadd.f32 %v782_v42, %v655_v43 }
 0x3a3   : > { %v829_v45 = vpop.f32.mrf.mxu0 }
 0x3a4   : > { %v661_v46 = vadd.f32 %v656_v44, %v478_v9 }
 0x3a5   : > { %v658_v47 = vpop.f32.mrf.mxu0 }
 0x3a6   : > { %662 = vst.msk [vmem:[%s393_s2] sm:$0xff] %vm434_vm1, %v661_v46 }
 0x3a7   : > { %v830_v48 = vpop.f32.mrf.mxu0 }
 0x3a8   : > { %911 = shalt.err (!%p908_p5)
}
 0x3a9   : > { %s912_s11 = scalar_lea.hbm %s1145_s22, 128  ;;  %s916_s19 = scalar_lea.hbm %s1202_s10, 256 }
 0x3aa   : > { %p913_p6 = scmp.ne.s32.totalorder %s1145_s22, %s912_s11  ;;  %p917_p10 = scmp.lt.s32.totalorder %s1145_s22, %s1202_s10 }
 0x3ab   : > { %p918_p11 = scmp.lt.s32.totalorder %s916_s19, %s912_s11 }
 0x3ac   : > { %p914_p7 = pnand %p913_p6, %p1074_p4 }
 0x3ad   : > { %p919_p12 = por %p918_p11, %p917_p10 }
 0x3ae   : > { %p915_p9 = pneg %p914_p7 }
 0x3b0   : > { %p920_p13 = pnand %p919_p12, %p915_p9 }
 0x3b2   : > { %923 = shalt.err (!%p920_p13)
}
 0x3b3   : > { %831 = dma.vmem_to_hbm [thread:$0]  (%p1074_p4), %s1147_s12, 128, %s1145_s22, %s664_s16  }
 0x3b4 PF: > { %p837_p0 = scmp.ge.s32.totalorder %s974_s18, 2  ;;  %s690_s24 = sand.u32 1, %s954_s13  }
 0x3b5   : > { %s691_s29 = scalar_lea.sflag [#allocation3], %s690_s24 }
 0x3b6   : > { %p834_p1 = pnand %p837_p0, %p1081_p8 }
 0x3b8   : > { %p835_p2 = pneg %p834_p1 }
 0x3ba   : > { %949 = dma.done.wait (%p835_p2), %s691_s29, 128  }
 0x3bb   : > { %951 = vsyncadd (%p835_p2), %s691_s29, 4294967168  ;;  %s23_s18 = sadd.s32 1, %s974_s18   ;;  %s1207_s13 = smov %s958_s14 }
 0x3bc   : > { %p20_p3 = scmp.ge.s32.totalorder %s23_s18, 4   ;;  %s1208_s14 = smov %s962_s15 }
 0x3bd   : > { %s1209_s15 = smov %s1087_s26  ;;  %s1210_s16 = smov %s970_s17 }
 0x3be   : > { %s1211_s17 = smov %s1213_s21  ;;  %22 = sbr.rel (!%p20_p3) target bundleno = 6 (0x6), region = 98 }
 0x3c3   :  { %696 = vsyncpa [#allocation3], 1 }
 0x3c4   :  { %698 = vsyncpa [#allocation3 + $0x1], 1 }

// kernel: transformer_encoder_layer.4
= control target key start
LH: loop header
LB: loop body
LE: loop exit
PB: predicated region body
PF: predicated region fallthrough
CT: control target
= control target key end

     0   :  { %s1048_s15 = smov 0   ;;  %s1050_s16 = smov 0   ;;  %s1149_s0 = inlined_call_operand.vmem [shape: bf16[2,4,8,8], index: 0, kind: input, shape index: {}]   ;;  %s1150_s1 = inlined_call_operand.vmem [shape: bf16[2,4,8,8], index: 1, kind: input, shape index: {}]   ;;  %s1151_s2 = inlined_call_operand.vmem [shape: bf16[2,4,8,8], index: 2, kind: input, shape index: {}]   ;;  %s1152_s3 = inlined_call_operand.vmem [shape: bf16[2,8,8], index: 3, kind: input, shape index: {}]   ;;  %s1153_s4 = inlined_call_operand.vmem [shape: bf16[2,4,8,8], index: 4, kind: output, shape index: {}]  }
   0x1   :  { %s1052_s17 = smov 0  }
   0x2 LB: > { %s26_s18 = sadd.s32 1, %s1015_s16  ;;  %p867_p0 = scmp.ge.s32.totalorder %s1019_s17, 1  ;;  %s1019_s17 = sphi %s1052_s17, %s14_s17   ;;  %s1015_s16 = sphi %s1050_s16, %s1155_s16   ;;  %s1011_s15 = sphi %s1048_s15, %s1154_s15  }
   0x3   : > { %p28_p1 = scmp.ge.s32.totalorder %s26_s18, 2  ;;  %p215_p2 = scmp.lt.s32.totalorder %s1019_s17, 3 }
   0x5   : > { %s1157_s18 = smov (%p28_p1, %s26_s18), 0  ;;  %p216_p3 = pnand %p867_p0, %p215_p2 }
   0x6   : > { %p264_p4 = scmp.lt.s32.totalorder (!%p216_p3), %s1011_s15, 1 }
   0x7   : > { %219 = sbr.rel (%p216_p3) target bundleno = 744 (0x2e8), region = 36 }
   0xc   : > { %v1021_v0 = vmov 0.0   ;;  %s1159_s15 = smov (!%p264_p4, %s1011_s15), 1  ;;  %vm1022_vm0 = vmmov 0   ;;  %vm314_vm1 = vcmask 64512   ;;  %vm550_vm3 = vcmask 1043456  }
   0xd   : > { %907 = vmatprep.subr.bf16.mxu0 %v1021_v0  ;;  %913 = vmatprep.subr.bf16.mxu1 %v1021_v0  ;;  %s1075_s19 = sshll.u32 %s1159_s15, 4  ;;  %s874_s26 = sshll.u32 %s1159_s15, 2  ;;  %vm736_vm4 = vcmask 60416  }
   0xe   : > { %909 = vmatprep.mubr.msk.bf16.mxu0 %vm1022_vm0, %v1021_v0  ;;  %915 = vmatprep.mubr.msk.bf16.mxu1 %vm1022_vm0, %v1021_v0  ;;  %s276_s22 = scalar_lea.vmem %s1150_s1, %s1075_s19  ;;  %s271_s25 = scalar_lea.vmem %s1149_s0, %s1075_s19 }
   0xf   : > { %v302_v1 = vld [vmem:[%s276_s22] sm:$0xf]  ;;  %v303_v2 = vld [vmem:[%s276_s22 + $0x4] sm:$0xf]  ;;  %v304_v5 = vld [vmem:[%s276_s22 + $0x8] sm:$0xf]  ;;  %s288_s29 = scalar_lea.vmem %s1152_s3, %s874_s26  ;;  %s281_s6 = scalar_lea.vmem %s1151_s2, %s1075_s19 }
  0x10   : > { %v319_v3 = vsel %vm314_vm1, %v302_v1, 0  ;;  %v365_v4 = vsel %vm314_vm1, %v303_v2, 0  ;;  %v305_v6 = vld [vmem:[%s276_s22 + $0xc] sm:$0xf]  ;;  %v298_v7 = vld [vmem:[%s271_s25] sm:$0xf]  ;;  %s296_s9 = scalar_lea.vmem %s1153_s4, %s1075_s19 }
  0x11   : > { %908 = vmatpush3.bf16.xpose.msra.mxu0 %v319_v3  ;;  %914 = vmatpush3.bf16.xpose.msra.mxu1 %v365_v4  ;;  %v299_v8 = vld [vmem:[%s271_s25 + $0x4] sm:$0xf]  ;;  %v411_v9 = vsel %vm314_vm1, %v304_v5, 0  ;;  %v457_v10 = vsel %vm314_vm1, %v305_v6, 0  ;;  %v300_v11 = vld [vmem:[%s271_s25 + $0x8] sm:$0xf] }
  0x12   : > { %919 = vmatprep.subr.bf16.mxu0 %v1021_v0  ;;  %925 = vmatprep.subr.bf16.mxu1 %v1021_v0  ;;  %v301_v12 = vld [vmem:[%s271_s25 + $0xc] sm:$0xf]  ;;  %v310_v13 = vld [vmem:[%s288_s29] sm:$0xf]  ;;  %v307_v61 = vld [vmem:[%s281_s6 + $0x4] sm:$0xf] }
  0x13   : > { %v311_v14 = vunpack.c.l.bf16 %v310_v13  ;;  %v306_v60 = vld [vmem:[%s281_s6] sm:$0xf]  ;;  %v598_v63 = vsel %vm550_vm3, %v307_v61, 0  ;;  %v308_v1 = vld [vmem:[%s281_s6 + $0x8] sm:$0xf] }
  0x14   : > { %v552_v62 = vsel %vm550_vm3, %v306_v60, 0  ;;  %v644_v2 = vsel %vm550_vm3, %v308_v1, 0  ;;  %v309_v3 = vld [vmem:[%s281_s6 + $0xc] sm:$0xf] }
  0x15   : > { %vm312_vm2 = vcmp.gt.f32.partialorder %v311_v14, 0.5  ;;  %v690_v4 = vsel %vm550_vm3, %v309_v3, 0 }
  0x16   : > { %v313_v15 = vsel %vm312_vm2, -1e+18, %v1021_v0 }
  0x18   : > { %910 = vmatmul.mubr.msk.bf16.vlgmr.msra.gmra.mxu0 %vm314_vm1, %v298_v7  ;;  %916 = vmatmul.mubr.msk.bf16.vlgmr.msra.gmra.mxu1 %vm314_vm1, %v299_v8 }
  0x19   : > { %920 = vmatpush3.bf16.xpose.msra.mxu0 %v411_v9  ;;  %926 = vmatpush3.bf16.xpose.msra.mxu1 %v457_v10 }
  0x1a   : > { %921 = vmatprep.mubr.msk.bf16.mxu0 %vm1022_vm0, %v1021_v0  ;;  %927 = vmatprep.mubr.msk.bf16.mxu1 %vm1022_vm0, %v1021_v0 }
  0x1b   : > { %931 = vmatprep.subr.bf16.mxu0 %v1021_v0  ;;  %937 = vmatprep.subr.bf16.mxu1 %v1021_v0 }
  0x20   : > { %922 = vmatmul.mubr.msk.bf16.vlgmr.msra.gmra.mxu0 %vm314_vm1, %v300_v11  ;;  %928 = vmatmul.mubr.msk.bf16.vlgmr.msra.gmra.mxu1 %vm314_vm1, %v301_v12 }
  0x21   : > { %933 = vmatprep.mubr.msk.bf16.mxu0 %vm1022_vm0, %v1021_v0  ;;  %939 = vmatprep.mubr.msk.bf16.mxu1 %vm1022_vm0, %v1021_v0 }
  0x22   : > { %932 = vmatpush3.bf16.msra.mxu0 %v552_v62  ;;  %938 = vmatpush3.bf16.msra.mxu1 %v598_v63 }
  0x23   : > { %943 = vmatprep.subr.bf16.mxu0 %v1021_v0  ;;  %949 = vmatprep.subr.bf16.mxu1 %v1021_v0 }
  0xd8   : > { %v355_v16 = vpop.f32.mrf.mxu0  ;;  %v401_v17 = vpop.f32.mrf.mxu1 }
  0xd9   : > { %v356_v18 = vadd.f32 %v355_v16, %v313_v15  ;;  %v402_v19 = vadd.f32 %v401_v17, %v313_v15 }
  0xda   : > { %v911_v20 = vpop.f32.mrf.mxu0  ;;  %v917_v21 = vpop.f32.mrf.mxu1 }
  0xdb   : > { %v499_v22 = vsel %vm314_vm1, %v356_v18, -inf  ;;  %v502_v25 = vsel %vm314_vm1, %v402_v19, -inf }
  0xdc   : > { %v404_v23 = vpop.f32.mrf.mxu1  ;;  %500 = vmax.xlane.f32.xlu0 %v499_v22  ;;  %v358_v24 = vpop.f32.mrf.mxu0 }
  0xde   : > { %v912_v26 = vpop.f32.mrf.mxu0  ;;  %v918_v27 = vpop.f32.mrf.mxu1 }
  0xe0   : > { %v493_v28 = vpop.f32.mrf.mxu1  ;;  %503 = vmax.xlane.f32.xlu0 %v502_v25  ;;  %v447_v29 = vpop.f32.mrf.mxu0 }
  0xe1   : > { %v494_v30 = vadd.f32 %v493_v28, %v313_v15  ;;  %v448_v31 = vadd.f32 %v447_v29, %v313_v15 }
  0xe2   : > { %v923_v32 = vpop.f32.mrf.mxu0  ;;  %v929_v33 = vpop.f32.mrf.mxu1 }
  0xe3   : > { %v505_v34 = vsel %vm314_vm1, %v448_v31, -inf  ;;  %v508_v37 = vsel %vm314_vm1, %v494_v30, -inf }
  0xe4   : > { %v496_v35 = vpop.f32.mrf.mxu1  ;;  %506 = vmax.xlane.f32.xlu1 %v505_v34  ;;  %v450_v36 = vpop.f32.mrf.mxu0 }
  0xe6   : > { %v924_v38 = vpop.f32.mrf.mxu0  ;;  %v930_v39 = vpop.f32.mrf.mxu1 }
  0xe8   : > { %509 = vmax.xlane.f32.xlu1 %v508_v37 }
 0x165   : > { %v501_v40 = vpop.xlane.xlu0 %500 }
 0x166   : > { %v511_v41 = vsub.f32 %v356_v18, %v501_v40 }
 0x168   : > { %v515_v42 = vmul.f32 1.442695, %v511_v41 }
 0x169   : > { %v504_v43 = vpop.xlane.xlu0 %503 }
 0x16a   : > { %981 = vpow2.f32 %v515_v42  ;;  %v512_v44 = vsub.f32 %v402_v19, %v504_v43 }
 0x16c   : > { %v517_v45 = vmul.f32 1.442695, %v512_v44 }
 0x16d   : > { %v507_v46 = vpop.xlane.xlu1 %506 }
 0x16e   : > { %983 = vpow2.f32 %v517_v45  ;;  %v513_v47 = vsub.f32 %v448_v31, %v507_v46 }
 0x170   : > { %v519_v48 = vmul.f32 1.442695, %v513_v47 }
 0x171   : > { %v510_v49 = vpop.xlane.xlu1 %509 }
 0x172   : > { %985 = vpow2.f32 %v519_v48  ;;  %v514_v50 = vsub.f32 %v494_v30, %v510_v49 }
 0x174   : > { %v521_v51 = vmul.f32 1.442695, %v514_v50 }
 0x176   : > { %987 = vpow2.f32 %v521_v51 }
 0x177   : > { %v982_v52 = vpop.eup %981 }
 0x178   : > { %v523_v53 = vsel %vm314_vm1, %v982_v52, 0.0 }
 0x179   : > { %524 = vadd.xlane.f32.xlu0 %v523_v53 }
 0x17b   : > { %v984_v54 = vpop.eup %983 }
 0x17c   : > { %v526_v55 = vsel %vm314_vm1, %v984_v54, 0.0 }
 0x17d   : > { %527 = vadd.xlane.f32.xlu1 %v526_v55 }
 0x17f   : > { %v986_v56 = vpop.eup %985 }
 0x180   : > { %v529_v57 = vsel %vm314_vm1, %v986_v56, 0.0 }
 0x181   : > { %530 = vadd.xlane.f32.xlu0 %v529_v57 }
 0x183   : > { %v988_v58 = vpop.eup %987 }
 0x184   : > { %v532_v59 = vsel %vm314_vm1, %v988_v58, 0.0 }
 0x185   : > { %533 = vadd.xlane.f32.xlu1 %v532_v59 }
 0x202   : > { %v525_v5 = vpop.xlane.xlu0 %524 }
 0x203   : > { %989 = vrcp.f32 %v525_v5 }
 0x206   : > { %v528_v6 = vpop.xlane.xlu1 %527 }
 0x207   : > { %991 = vrcp.f32 %v528_v6 }
 0x20a   : > { %v531_v7 = vpop.xlane.xlu0 %530 }
 0x20b   : > { %993 = vrcp.f32 %v531_v7 }
 0x20e   : > { %v534_v8 = vpop.xlane.xlu1 %533 }
 0x20f   : > { %995 = vrcp.f32 %v534_v8 }
 0x210   : > { %v990_v9 = vpop.eup %989 }
 0x211   : > { %v539_v10 = vmul.f32 %v990_v9, %v982_v52 }
 0x213   : > { %v543_v11 = vpack.c.bf16 %v539_v10, %v539_v10 }
 0x214   : > { %v992_v12 = vpop.eup %991 }
 0x215   : > { %934 = vmatmul.mubr.msk.bf16.vlgmr.msra.gmra.mxu0 %vm314_vm1, %v543_v11  ;;  %v540_v13 = vmul.f32 %v992_v12, %v984_v54 }
 0x216   : > { %944 = vmatpush3.bf16.msra.mxu0 %v644_v2  ;;  %945 = vmatprep.mubr.msk.bf16.mxu0 %vm1022_vm0, %v1021_v0 }
 0x217   : > { %v544_v14 = vpack.c.bf16 %v540_v13, %v540_v13 }
 0x218   : > { %v994_v15 = vpop.eup %993 }
 0x219   : > { %940 = vmatmul.mubr.msk.bf16.vlgmr.msra.gmra.mxu1 %vm314_vm1, %v544_v14  ;;  %v541_v16 = vmul.f32 %v994_v15, %v986_v56 }
 0x21a   : > { %950 = vmatpush3.bf16.msra.mxu1 %v690_v4  ;;  %951 = vmatprep.mubr.msk.bf16.mxu1 %vm1022_vm0, %v1021_v0 }
 0x21b   : > { %v545_v17 = vpack.c.bf16 %v541_v16, %v541_v16 }
 0x21c   : > { %v996_v18 = vpop.eup %995 }
 0x21d   : > { %946 = vmatmul.mubr.msk.bf16.vlgmr.msra.gmra.mxu0 %vm314_vm1, %v545_v17  ;;  %v542_v19 = vmul.f32 %v996_v18, %v988_v58 }
 0x21f   : > { %v546_v20 = vpack.c.bf16 %v542_v19, %v542_v19 }
 0x221   : > { %952 = vmatmul.mubr.msk.bf16.vlgmr.msra.gmra.mxu1 %vm314_vm1, %v546_v20 }
 0x2d5   : > { %v588_v21 = vpop.f32.mrf.mxu0 }
 0x2d6   : > { %v732_v22 = vpack.c.bf16 %v588_v21, %v588_v21 }
 0x2d7   : > { %v935_v23 = vpop.f32.mrf.mxu0 }
 0x2d8   : > { %737 = vst.msk [vmem:[%s296_s9] sm:$0xf] %vm736_vm4, %v732_v22 }
 0x2d9   : > { %v591_v24 = vpop.f32.mrf.mxu0  ;;  %v634_v0 = vpop.f32.mrf.mxu1 }
 0x2da   : > { %v733_v25 = vpack.c.bf16 %v634_v0, %v634_v0 }
 0x2db   : > { %v936_v26 = vpop.f32.mrf.mxu0  ;;  %v941_v27 = vpop.f32.mrf.mxu1 }
 0x2dc   : > { %738 = vst.msk [vmem:[%s296_s9 + $0x4] sm:$0xf] %vm736_vm4, %v733_v25 }
 0x2dd   : > { %v637_v28 = vpop.f32.mrf.mxu1  ;;  %v680_v29 = vpop.f32.mrf.mxu0 }
 0x2de   : > { %v734_v30 = vpack.c.bf16 %v680_v29, %v680_v29 }
 0x2df   : > { %v942_v31 = vpop.f32.mrf.mxu1  ;;  %v947_v32 = vpop.f32.mrf.mxu0 }
 0x2e0   : > { %739 = vst.msk [vmem:[%s296_s9 + $0x8] sm:$0xf] %vm736_vm4, %v734_v30 }
 0x2e1   : > { %v683_v33 = vpop.f32.mrf.mxu0  ;;  %v726_v34 = vpop.f32.mrf.mxu1 }
 0x2e2   : > { %v735_v35 = vpack.c.bf16 %v726_v34, %v726_v34 }
 0x2e3   : > { %v948_v36 = vpop.f32.mrf.mxu0  ;;  %v953_v37 = vpop.f32.mrf.mxu1 }
 0x2e4   : > { %740 = vst.msk [vmem:[%s296_s9 + $0xc] sm:$0xf] %vm736_vm4, %v735_v35 }
 0x2e5   : > { %v729_v38 = vpop.f32.mrf.mxu1 }
 0x2e7   : > { %v954_v39 = vpop.f32.mrf.mxu1 }
 0x2e8 PF: > { %s14_s17 = sadd.s32 1, %s1019_s17   ;;  %s1154_s15 = smov %s1015_s16 }
 0x2e9   : > { %p11_p5 = scmp.ge.s32.totalorder %s14_s17, 4   ;;  %s1155_s16 = smov %s1157_s18 }
 0x2eb   :  { %13 = sbr.rel (!%p11_p5) target bundleno = 2 (0x2), region = 75 }

</bundles_post_ra>
